<compile_context>
chip_gen: v7x
topology: tpu7x:2x2x1
jax: 0.10.0
libtpu: 0.0.40
codegen_flags: <defaults>
</compile_context>

<pallas_src>
import functools

import jax
import jax.numpy as jnp
from jax.experimental import pallas as pl
from jax.experimental.pallas import tpu as pltpu

LANES = 128            # vreg lane width (last dim)
SUB = 8                # f32 vreg sublane height
MAX_TILE_ROWS = 4096   # (4096,128) f32 tile = 2 MiB/input; x2 inputs x2 bufs = 8 MiB VMEM


def _loss_kernel(x_ref, y_ref, o_ref, acc_ref, *,
                 steps_per_core, tile_rows, valid_rows, may_need_mask):
    c = pl.program_id(0)   # core-split index (CORE_PARALLEL on v7x, size 1 otherwise)
    i = pl.program_id(1)   # row-block index within this split ("arbitrary")

    @pl.when(i == 0)
    def _():
        acc_ref[...] = jnp.zeros_like(acc_ref)

    # t = |x - y| in f32 (the torch.where branch is unreachable for t >= 0).
    t = jnp.abs(x_ref[...].astype(jnp.float32) - y_ref[...].astype(jnp.float32))

    acc_rows = acc_ref.shape[0]

    def accumulate(vals):
        # Fold (tile_rows,128) into (acc_rows,128): acc_rows//8 independent
        # (8,128) vreg add chains — pure VPU, no cross-lane reduce in the loop.
        acc_ref[...] += vals.reshape(-1, acc_rows, LANES).sum(axis=0)

    if may_need_mask:
        b = c * steps_per_core + i          # unclamped global block index
        block_end = (b + 1) * tile_rows

        @pl.when(block_end <= valid_rows)   # interior block: no mask work at all
        def _():
            accumulate(t)

        @pl.when(block_end > valid_rows)    # tail / clamped out-of-range block
        def _():
            row_ids = b * tile_rows + jax.lax.broadcasted_iota(jnp.int32, t.shape, 0)
            # where-select (not a multiply) so garbage/NaN from the undefined
            # region of a partial DMA cannot leak into the sum.
            accumulate(jnp.where(row_ids < valid_rows, t, 0.0))
    else:
        accumulate(t)

    @pl.when(i == steps_per_core - 1)
    def _():
        o_ref[...] = acc_ref[...]


def _num_tensorcore_splits():
    """2 on v7x (2 TensorCores per chip), 1 on single-TC v5e/v6e."""
    try:
        dev = jax.devices()[0]
        if dev.platform != "tpu":
            return 1
        kind = str(getattr(dev, "device_kind", "")).lower()
        if "v7" in kind or "7x" in kind:
            return 2
    except Exception:
        pass
    return 1


def my_loss_pallas(x, y):
    """Pallas TPU implementation of my_loss.forward(x, y) -> scalar mean."""
    assert x.shape == y.shape, "x and y must have identical shapes"
    n = x.size

    xf = x.reshape(-1)
    yf = y.reshape(-1)

    itemsize = x.dtype.itemsize
    # dtype-specific sublane multiple for the (rows, 128) view: 8/16/32 rows
    # for 4/2/1-byte dtypes (packed-tile layout safety).
    sub_rows = SUB * max(1, 4 // max(1, itemsize))
    align = sub_rows * LANES
    n_main = (n // align) * align

    total = jnp.zeros((), jnp.float32)

    # Ragged tail (< align elements): plain-JAX sum — avoids a full-array
    # jnp.pad copy (an extra HBM read+write of both inputs).
    if n_main < n:
        xt = xf[n_main:].astype(jnp.float32)
        yt = yf[n_main:].astype(jnp.float32)
        total = total + jnp.sum(jnp.abs(xt - yt))

    if n_main > 0:
        rows = n_main // LANES                     # multiple of sub_rows
        x2 = xf[:n_main].reshape(rows, LANES)      # free view in the aligned case
        y2 = yf[:n_main].reshape(rows, LANES)

        tile_rows = min(MAX_TILE_ROWS, rows)       # multiple of sub_rows either way
        nb = pl.cdiv(rows, tile_rows)              # number of row blocks

        num_splits = min(_num_tensorcore_splits(), nb)
        spc = pl.cdiv(nb, num_splits)              # row blocks per core split
        may_need_mask = (num_splits * spc * tile_rows != rows)

        # Up to 4 independent (8,128) accumulator chains.
        if tile_rows % 32 == 0:
            acc_rows = 32
        elif tile_rows % 16 == 0:
            acc_rows = 16
        else:
            acc_rows = 8

        def in_map(c, i):
            # Clamp so out-of-range blocks re-read the last valid block (same
            # block index => no fresh DMA); the kernel masks them to zero.
            return (jnp.minimum(c * spc + i, nb - 1), 0)

        kernel = functools.partial(
            _loss_kernel,
            steps_per_core=spc, tile_rows=tile_rows,
            valid_rows=rows, may_need_mask=may_need_mask)

        if num_splits > 1:
            dim_sems = (getattr(pltpu, "CORE_PARALLEL", "parallel"),
                        getattr(pltpu, "ARBITRARY", "arbitrary"))
        else:
            dim_sems = ("arbitrary", "arbitrary")

        cost = pl.CostEstimate(
            flops=3 * n_main,
            transcendentals=0,
            bytes_accessed=2 * n_main * itemsize + num_splits * acc_rows * LANES * 4)

        # TODO(synk): if xprof ever shows exposed DMA, sweep
        # pipeline_mode=pl.Buffered(3) on the two input BlockSpecs.
        partials = pl.pallas_call(
            kernel,
            out_shape=jax.ShapeDtypeStruct((num_splits * acc_rows, LANES), jnp.float32),
            grid_spec=pltpu.PrefetchScalarGridSpec(
                num_scalar_prefetch=0,
                grid=(num_splits, spc),
                in_specs=[
                    pl.BlockSpec((tile_rows, LANES), in_map),
                    pl.BlockSpec((tile_rows, LANES), in_map),
                ],
                out_specs=pl.BlockSpec((acc_rows, LANES), lambda c, i: (c, 0)),
                scratch_shapes=[pltpu.VMEM((acc_rows, LANES), jnp.float32)],
            ),
            compiler_params=pltpu.CompilerParams(
                dimension_semantics=dim_sems,
            ),
            cost_estimate=cost,
        )(x2, y2)

        # Tiny final reduction of the lane-dense partial sums.
        total = total + jnp.sum(partials)

    return total / jnp.float32(n)


if __name__ == "__main__":
    key = jax.random.PRNGKey(0)
    kx, ky = jax.random.split(key)
    # small shapes consistent with an arbitrary-tensor loss: (2, 4, 16, 16)
    x = jax.random.normal(kx, (2, 4, 16, 16), dtype=jnp.float32)
    y = jax.random.normal(ky, (2, 4, 16, 16), dtype=jnp.float32)

    loss = my_loss_pallas(x, y)
    jax.block_until_ready(loss)

    # pure-JAX reference with identical semantics to the PyTorch module
    t = jnp.abs(x - y)
    ref = jnp.mean(jnp.where(t > -0.0001, t, t * t))

    assert jnp.allclose(loss, ref, rtol=1e-6, atol=1e-6), (loss, ref)
    print("KERNEL_OK")
</pallas_src>

<mosaic_0001>
module attributes {stable_mosaic.version = 11 : i64} {
  func.func @_loss_kernel(%arg0: i32, %arg1: i32, %arg2: memref<16x128xf32, #tpu.memory_space<vmem>>, %arg3: memref<16x128xf32, #tpu.memory_space<vmem>>, %arg4: memref<16x128xf32, #tpu.memory_space<vmem>>, %arg5: memref<16x128xf32, #tpu.memory_space<vmem>>) attributes {dimension_semantics = [#tpu.dimension_semantics<arbitrary>, #tpu.dimension_semantics<arbitrary>], iteration_bounds = array<i64: 1, 1>, scalar_prefetch = 0 : i64, scratch_operands = 1 : i64, tpu.core_type = #tpu.core_type<tc>, window_params = [{transform_indices = @transform_0, window_bounds = array<i64: 16, 128>}, {transform_indices = @transform_1, window_bounds = array<i64: 16, 128>}, {transform_indices = @transform_2, window_bounds = array<i64: 16, 128>}]} {
    %c0_i32 = arith.constant 0 : i32
    %0 = arith.cmpi eq, %arg1, %c0_i32 : i32
    %1 = arith.extui %0 : i1 to i32
    %c0_i32_0 = arith.constant 0 : i32
    %2 = arith.cmpi ne, %1, %c0_i32_0 : i32
    scf.if %2 {
      %cst_10 = arith.constant 0.000000e+00 : f32
      %15 = vector.broadcast %cst_10 : f32 to vector<16x128xf32>
      %c0_11 = arith.constant 0 : index
      %c0_12 = arith.constant 0 : index
      %16 = vector.load %arg5[%c0_11, %c0_12] : memref<16x128xf32, #tpu.memory_space<vmem>>, vector<16x128xf32>
      tpu.vector_store %arg5[%c0_11, %c0_12], %15 {strides = array<i32>} : memref<16x128xf32, #tpu.memory_space<vmem>>, vector<16x128xf32>,
    } else {
    }
    %c0 = arith.constant 0 : index
    %c0_1 = arith.constant 0 : index
    %3 = vector.load %arg2[%c0, %c0_1] : memref<16x128xf32, #tpu.memory_space<vmem>>, vector<16x128xf32>
    %c0_2 = arith.constant 0 : index
    %c0_3 = arith.constant 0 : index
    %4 = vector.load %arg3[%c0_2, %c0_3] : memref<16x128xf32, #tpu.memory_space<vmem>>, vector<16x128xf32>
    %5 = arith.subf %3, %4 : vector<16x128xf32>
    %6 = math.absf %5 : vector<16x128xf32>
    %c0_4 = arith.constant 0 : index
    %c0_5 = arith.constant 0 : index
    %7 = vector.load %arg5[%c0_4, %c0_5] : memref<16x128xf32, #tpu.memory_space<vmem>>, vector<16x128xf32>
    %8 = vector.shape_cast %6 : vector<16x128xf32> to vector<1x16x128xf32>
    %cst = arith.constant dense<0.000000e+00> : vector<16x128xf32>
    %9 = vector.multi_reduction <add>, %8, %cst [0] : vector<1x16x128xf32> to vector<16x128xf32>
    %10 = arith.addf %7, %9 : vector<16x128xf32>
    %c0_6 = arith.constant 0 : index
    %c0_7 = arith.constant 0 : index
    %11 = vector.load %arg5[%c0_6, %c0_7] : memref<16x128xf32, #tpu.memory_space<vmem>>, vector<16x128xf32>
    tpu.vector_store %arg5[%c0_6, %c0_7], %10 {strides = array<i32>} : memref<16x128xf32, #tpu.memory_space<vmem>>, vector<16x128xf32>,
    %c0_i32_8 = arith.constant 0 : i32
    %12 = arith.cmpi eq, %arg1, %c0_i32_8 : i32
    %13 = arith.extui %12 : i1 to i32
    %c0_i32_9 = arith.constant 0 : i32
    %14 = arith.cmpi ne, %13, %c0_i32_9 : i32
    scf.if %14 {
      %c0_10 = arith.constant 0 : index
      %c0_11 = arith.constant 0 : index
      %15 = vector.load %arg5[%c0_10, %c0_11] : memref<16x128xf32, #tpu.memory_space<vmem>>, vector<16x128xf32>
      %c0_12 = arith.constant 0 : index
      %c0_13 = arith.constant 0 : index
      %16 = vector.load %arg4[%c0_12, %c0_13] : memref<16x128xf32, #tpu.memory_space<vmem>>, vector<16x128xf32>
      tpu.vector_store %arg4[%c0_12, %c0_13], %15 {strides = array<i32>} : memref<16x128xf32, #tpu.memory_space<vmem>>, vector<16x128xf32>,
    } else {
    }
    return
  }
  func.func @transform_0(%arg0: i32, %arg1: i32) -> (i32, i32) {
    %c1_i32 = arith.constant 1 : i32
    %0 = arith.muli %arg0, %c1_i32 : i32
    %1 = arith.addi %0, %arg1 : i32
    %c0_i32 = arith.constant 0 : i32
    %2 = arith.minsi %1, %c0_i32 : i32
    %c0_i32_0 = arith.constant 0 : i32
    %c0_i32_1 = arith.constant 0 : i32
    return %2, %c0_i32_0 : i32, i32
  }
  func.func @transform_1(%arg0: i32, %arg1: i32) -> (i32, i32) {
    %c1_i32 = arith.constant 1 : i32
    %0 = arith.muli %arg0, %c1_i32 : i32
    %1 = arith.addi %0, %arg1 : i32
    %c0_i32 = arith.constant 0 : i32
    %2 = arith.minsi %1, %c0_i32 : i32
    %c0_i32_0 = arith.constant 0 : i32
    %c0_i32_1 = arith.constant 0 : i32
    return %2, %c0_i32_0 : i32, i32
  }
  func.func @transform_2(%arg0: i32, %arg1: i32) -> (i32, i32) {
    %c0_i32 = arith.constant 0 : i32
    %c0_i32_0 = arith.constant 0 : i32
    return %arg0, %c0_i32 : i32, i32
  }
}

</mosaic_0001>

<bundles_post_ra>
// kernel: tpu_custom_call.1
= control target key start
LH: loop header
LB: loop body
LE: loop exit
PB: predicated region body
PF: predicated region fallthrough
CT: control target
= control target key end

     0   :  { %7 = vsyncpa [#allocation4], 0  ;;  %s253_s0 = inlined_call_operand.hbm [shape: f32[16,128], index: 0, kind: input, shape index: {}]   ;;  %s254_s1 = inlined_call_operand.hbm [shape: f32[16,128], index: 1, kind: input, shape index: {}]   ;;  %s255_s2 = inlined_call_operand.hbm [shape: f32[16,128], index: 2, kind: output, shape index: {}]  }
   0x1   :  { %8 = vsyncpa [#allocation7], 0 }
   0x2   :  { %9 = vsyncpa [#allocation5], 0  ;;  %s188_s9 = smov [#allocation3]   ;;  %s116_s13 = scalar_lea.hbm %s253_s0, 256 }
   0x3   :  { %s21_s10 = sshll.u32 %s188_s9, 4  ;;  %p117_p0 = scmp.ne.s32.totalorder %s253_s0, %s116_s13  ;;  %s22_s10 = int_to_ptr.vmem [resolvable:$true] %s21_s10 }
   0x4   :  { %p120_p1 = scmp.lt.u32.totalorder %s116_s13, %s253_s0 }
   0x6   :  { %p122_p2 = pnand %p120_p1, %p117_p0 }
   0x8   :  { %125 = shalt.err (!%p122_p2)
}
   0x9   :  { %s126_s18 = scalar_lea.vmem %s22_s10, 256  ;;  %p131_p4 = scmp.lt.s32.totalorder %s22_s10, %s22_s10 }
   0xa   :  { %p127_p3 = scmp.ne.s32.totalorder %s22_s10, %s126_s18  ;;  %p132_p5 = scmp.lt.s32.totalorder %s126_s18, %s126_s18 }
   0xc   :  { %p133_p6 = por %p132_p5, %p131_p4 }
   0xe   :  { %p134_p7 = pnand %p133_p6, %p127_p3 }
  0x10   :  { %137 = shalt.err (!%p134_p7)
}
  0x11   :  { %s189_s19 = smov 128   ;;  %s190_s20 = smov 8  }
  0x12   :  { %27 = dma.hbm_to_vmem [thread:$0]  %s253_s0, 256, %s22_s10, [#allocation4], %s189_s19, %s189_s19, %s190_s20  }
  0x13   :  { %s191_s23 = smov [#allocation6]   ;;  %s138_s27 = scalar_lea.hbm %s254_s1, 256 }
  0x14   :  { %s39_s24 = sshll.u32 %s191_s23, 4  ;;  %p139_p8 = scmp.ne.s32.totalorder %s254_s1, %s138_s27  ;;  %s40_s24 = int_to_ptr.vmem [resolvable:$true] %s39_s24 }
  0x15   :  { %p142_p9 = scmp.lt.u32.totalorder %s138_s27, %s254_s1 }
  0x17   :  { %p144_p10 = pnand %p142_p9, %p139_p8 }
  0x19   :  { %147 = shalt.err (!%p144_p10)
}
  0x1a   :  { %s148_s4 = scalar_lea.vmem %s40_s24, 256  ;;  %p153_p12 = scmp.lt.s32.totalorder %s40_s24, %s40_s24 }
  0x1b   :  { %p149_p11 = scmp.ne.s32.totalorder %s40_s24, %s148_s4  ;;  %p154_p13 = scmp.lt.s32.totalorder %s148_s4, %s148_s4 }
  0x1d   :  { %p155_p0 = por %p154_p13, %p153_p12 }
  0x1f   :  { %p156_p1 = pnand %p155_p0, %p149_p11 }
  0x21   :  { %159 = shalt.err (!%p156_p1)
}
  0x22   :  { %45 = dma.hbm_to_vmem [thread:$0]  %s254_s1, 256, %s40_s24, [#allocation7], %s189_s19, %s189_s19, %s190_s20  }
  0x23   :  { %182 = dma.done.wait [#allocation4], 256  }
  0x24   :  { %183 = vsyncadd [#allocation4], 4294967040 }
  0x25   :  { %184 = dma.done.wait [#allocation7], 256  }
  0x26   :  { %185 = vsyncadd [#allocation7], 4294967040  ;;  %v66_v0 = vld [vmem:[#allocation3] sm:$0xff]  ;;  %v68_v1 = vld [vmem:[#allocation6] sm:$0xff]  ;;  %s192_s6 = smov [#allocation8]  }
  0x27   :  { %v67_v2 = vld [vmem:[#allocation3 + $0x8] sm:$0xff]  ;;  %v70_v3 = vsub.f32 %v66_v0, %v68_v1  ;;  %v69_v4 = vld [vmem:[#allocation6 + $0x8] sm:$0xff]  ;;  %s94_s7 = sshll.u32 %s192_s6, 4  ;;  %s95_s7 = int_to_ptr.vmem [resolvable:$true] %s94_s7 }
  0x28   :  { %v71_v5 = vsub.f32 %v67_v2, %v69_v4  ;;  %s160_s8 = scalar_lea.vmem %s95_s7, 256  ;;  %p165_p3 = scmp.lt.s32.totalorder %s95_s7, %s95_s7 }
  0x29   :  { %v72_v6 = vand.u32 2147483647, %v70_v3  ;;  %p161_p2 = scmp.ne.s32.totalorder %s95_s7, %s160_s8  ;;  %p166_p4 = scmp.lt.s32.totalorder %s160_s8, %s160_s8 }
  0x2a   :  { %v73_v7 = vand.u32 2147483647, %v71_v5 }
  0x2b   :  { %87 = vst [vmem:[#allocation8] sm:$0xff] %v72_v6  ;;  %p167_p5 = por %p166_p4, %p165_p3 }
  0x2c   :  { %88 = vst [vmem:[#allocation8 + $0x8] sm:$0xff] %v73_v7 }
  0x2d   :  { %p168_p6 = pnand %p167_p5, %p161_p2 }
  0x2f   :  { %171 = shalt.err (!%p168_p6)
}
  0x30   :  { %s172_s10 = scalar_lea.hbm %s255_s2, 256 }
  0x31   :  { %p173_p7 = scmp.ne.s32.totalorder %s255_s2, %s172_s10  ;;  %p176_p8 = scmp.lt.u32.totalorder %s172_s10, %s255_s2 }
  0x33   :  { %p178_p9 = pnand %p176_p8, %p173_p7 }
  0x35   :  { %181 = shalt.err (!%p178_p9)
}
  0x36   :  { %100 = dma.vmem_to_hbm [thread:$0]  %s95_s7, 256, %s255_s2, [#allocation5], %s189_s19, %s189_s19, %s190_s20  }
  0x37   :  { %186 = dma.done.wait [#allocation5], 256  }
  0x38   :  { %187 = vsyncadd [#allocation5], 4294967040 }
  0x39   :  { %104 = vsyncpa [#allocation4], 1 }
  0x3a   :  { %105 = vsyncpa [#allocation7], 1 }
  0x3b   :  { %106 = vsyncpa [#allocation5], 1 }

</bundles_post_ra>
